<compile_context>
chip_gen: v7x
topology: tpu7x:2x2x1
jax: 0.10.0
libtpu: 0.0.40
codegen_flags: <defaults>
</compile_context>

<pallas_src>
import jax
import jax.numpy as jnp
from jax.experimental import pallas as pl
from jax.experimental.pallas import tpu as pltpu


def _round_up(x: int, m: int) -> int:
    return (x + m - 1) // m * m


def bilinear_kernel(b_ref, z_ref, m_ref, out_ref):
    """One edge-row tile of the packed bilinear (quadratic) form.

    b_ref  : SMEM (1,)            f32   bias
    z_ref  : VMEM (TE, D_pad)     bf16  packed [x_s | x_t] rows for this tile
    m_ref  : VMEM (D_pad, D_pad)  bf16  packed weight [[0, W], [0, 0]] (resident)
    out_ref: VMEM (TE, 1)         f32   logits for this tile
    """
    z = z_ref[...]                                                    # (TE, D) bf16
    # MXU: (TE, D) @ (D, D) -> (TE, D), f32 accumulation.
    t = jnp.dot(z, m_ref[...], preferred_element_type=jnp.float32)
    # VPU multiply + XLU lane reduction: logits[e] = sum_j t[e, j] * z[e, j].
    prod = t * z.astype(jnp.float32)
    out_ref[...] = jnp.sum(prod, axis=-1, keepdims=True) + b_ref[0]


def bilinear_forward(x_source, x_target, edge_label_index, weight, bias, *,
                     edge_tile: int = 512):
    """Pallas forward of torch.nn.Bilinear(S, T, 1) over edge_label_index pairs.

    x_source: (Ns, S) f32, x_target: (Nt, T) f32, edge_label_index: (2, E) int32,
    weight: (1, S, T) f32 (torch layout), bias: (1,) f32.  Returns (E,) f32 logits.
    """
    src_ix = edge_label_index[0]
    tgt_ix = edge_label_index[1]
    e = src_ix.shape[0]
    s = x_source.shape[1]
    t = x_target.shape[1]

    # Row gather (the HeteroData indexing) as XLA glue.
    xs = jnp.take(x_source, src_ix, axis=0)          # (E, S)
    xt = jnp.take(x_target, tgt_ix, axis=0)          # (E, T)

    # Pack each edge into a single lane-dense row z = [x_s | x_t], zero-padded
    # to a multiple of 128 lanes; edges padded to a multiple of the row tile
    # (multiple of 16 for bf16 sublane packing).
    d_pad = _round_up(max(s + t, 128), 128)
    te = _round_up(min(edge_tile, _round_up(e, 16)), 16)
    e_pad = _round_up(e, te)

    z = jnp.concatenate([xs, xt], axis=1)                              # (E, S+T)
    z = jnp.pad(z, ((0, e_pad - e), (0, d_pad - (s + t)))).astype(jnp.bfloat16)

    # Packed weight M = [[0, W], [0, 0]]  so that  z^T M z = x_s^T W x_t.
    # Zero padding contributes exactly zero; padded edge rows produce bias-only
    # values and are sliced off below.
    m = jnp.zeros((d_pad, d_pad), jnp.float32).at[:s, s:s + t].set(weight[0])
    m = m.astype(jnp.bfloat16)

    b = bias.reshape((1,)).astype(jnp.float32)

    grid = (e_pad // te,)
    out = pl.pallas_call(
        bilinear_kernel,
        out_shape=jax.ShapeDtypeStruct((e_pad, 1), jnp.float32),
        grid=grid,
        in_specs=[
            pl.BlockSpec(memory_space=pltpu.MemorySpace.SMEM),      # bias scalar
            pl.BlockSpec((te, d_pad), lambda i: (i, 0)),            # packed rows (pipelined)
            pl.BlockSpec((d_pad, d_pad), lambda i: (0, 0)),         # packed weight (resident)
        ],
        out_specs=pl.BlockSpec((te, 1), lambda i: (i, 0)),
        compiler_params=pltpu.CompilerParams(
            dimension_semantics=("parallel",),                      # v7x: split tiles across TCs
            vmem_limit_bytes=32 * 1024 * 1024,
        ),
    )(b, z, m)

    return out[:e, 0]


def bilinear_reference(x_source, x_target, edge_label_index, weight, bias):
    """Pure-JAX reference mirroring the kernel's bf16-input / f32-accumulate path."""
    xs = x_source[edge_label_index[0]].astype(jnp.bfloat16).astype(jnp.float32)
    xt = x_target[edge_label_index[1]].astype(jnp.bfloat16).astype(jnp.float32)
    w = weight[0].astype(jnp.bfloat16).astype(jnp.float32)
    return jnp.einsum("es,st,et->e", xs, w, xt) + bias[0]


if __name__ == "__main__":
    # Small shapes consistent with the module; feature dims deliberately not
    # multiples of 128 to exercise the packing/padding path.
    source_size = 48
    target_size = 32
    n_source, n_target, n_edges = 64, 80, 200

    key = jax.random.PRNGKey(0)
    k1, k2, k3, k4, k5, k6 = jax.random.split(key, 6)

    x_source = jax.random.normal(k1, (n_source, source_size), jnp.float32)
    x_target = jax.random.normal(k2, (n_target, target_size), jnp.float32)
    edge_label_index = jnp.stack([
        jax.random.randint(k3, (n_edges,), 0, n_source, jnp.int32),
        jax.random.randint(k4, (n_edges,), 0, n_target, jnp.int32),
    ]).astype(jnp.int32)

    # torch.nn.Bilinear(S, T, 1) defaults: weight (1, S, T), bias (1,),
    # both ~ U(-1/sqrt(S), 1/sqrt(S)).
    bound = 1.0 / float(jnp.sqrt(jnp.float32(source_size)))
    weight = jax.random.uniform(k5, (1, source_size, target_size), jnp.float32,
                                -bound, bound)
    bias = jax.random.uniform(k6, (1,), jnp.float32, -bound, bound)

    logits = bilinear_forward(x_source, x_target, edge_label_index, weight, bias)
    logits = jax.block_until_ready(logits)

    ref = bilinear_reference(x_source, x_target, edge_label_index, weight, bias)
    assert logits.shape == (n_edges,)
    assert jnp.allclose(logits, ref, rtol=2e-3, atol=2e-3), "mismatch vs JAX reference"

    print("KERNEL_OK")
</pallas_src>

<mosaic_0001>
module attributes {stable_mosaic.version = 11 : i64} {
  func.func @bilinear_kernel(%arg0: i32, %arg1: memref<1xf32, #tpu.memory_space<smem>>, %arg2: memref<208x128xbf16, #tpu.memory_space<vmem>>, %arg3: memref<128x128xbf16, #tpu.memory_space<vmem>>, %arg4: memref<208x1xf32, #tpu.memory_space<vmem>>) attributes {dimension_semantics = [#tpu.dimension_semantics<parallel>], iteration_bounds = array<i64: 1>, scalar_prefetch = 0 : i64, scratch_operands = 0 : i64, tpu.core_type = #tpu.core_type<tc>, window_params = [{transform_indices = @transform_0, window_bounds = array<i64: 1>}, {transform_indices = @transform_1, window_bounds = array<i64: 208, 128>}, {pipeline_mode = #tpu.pipeline_mode<synchronous>, transform_indices = @transform_2, window_bounds = array<i64: 128, 128>}, {transform_indices = @transform_3, window_bounds = array<i64: 208, 1>}]} {
    %c0 = arith.constant 0 : index
    %c0_0 = arith.constant 0 : index
    %0 = vector.load %arg2[%c0, %c0_0] : memref<208x128xbf16, #tpu.memory_space<vmem>>, vector<208x128xbf16>
    %c0_1 = arith.constant 0 : index
    %c0_2 = arith.constant 0 : index
    %1 = vector.load %arg3[%c0_1, %c0_2] : memref<128x128xbf16, #tpu.memory_space<vmem>>, vector<128x128xbf16>
    %cst = arith.constant dense<0.000000e+00> : vector<208x128xf32>
    %2 = tpu.matmul %0, %1, %cst {dimension_numbers = #tpu.dot_dimension_numbers<[1], [0], [0], [1], [0, 0, 1, 1], [], []>} : vector<208x128xbf16>, vector<128x128xbf16>, vector<208x128xf32> -> vector<208x128xf32>
    %3 = arith.extf %0 : vector<208x128xbf16> to vector<208x128xf32>
    %4 = arith.mulf %2, %3 : vector<208x128xf32>
    %cst_3 = arith.constant dense<0.000000e+00> : vector<208xf32>
    %5 = vector.multi_reduction <add>, %4, %cst_3 [1] : vector<208x128xf32> to vector<208xf32>
    %6 = vector.shape_cast %5 : vector<208xf32> to vector<208x1xf32>
    %c0_4 = arith.constant 0 : index
    %7 = memref.load %arg1[%c0_4] : memref<1xf32, #tpu.memory_space<smem>>
    %8 = vector.broadcast %7 : f32 to vector<208x1xf32>
    %9 = arith.addf %6, %8 : vector<208x1xf32>
    %c0_5 = arith.constant 0 : index
    %c0_6 = arith.constant 0 : index
    %10 = vector.load %arg4[%c0_5, %c0_6] : memref<208x1xf32, #tpu.memory_space<vmem>>, vector<208x1xf32>
    tpu.vector_store %arg4[%c0_5, %c0_6], %9 {strides = array<i32>} : memref<208x1xf32, #tpu.memory_space<vmem>>, vector<208x1xf32>,
    return
  }
  func.func @transform_0(%arg0: i32) -> i32 {
    %c0_i32 = arith.constant 0 : i32
    %c0_i32_0 = arith.constant 0 : i32
    return %c0_i32 : i32
  }
  func.func @transform_1(%arg0: i32) -> (i32, i32) {
    %c0_i32 = arith.constant 0 : i32
    %c0_i32_0 = arith.constant 0 : i32
    return %arg0, %c0_i32 : i32, i32
  }
  func.func @transform_2(%arg0: i32) -> (i32, i32) {
    %c0_i32 = arith.constant 0 : i32
    %c0_i32_0 = arith.constant 0 : i32
    %c0_i32_1 = arith.constant 0 : i32
    return %c0_i32, %c0_i32_0 : i32, i32
  }
  func.func @transform_3(%arg0: i32) -> (i32, i32) {
    %c0_i32 = arith.constant 0 : i32
    %c0_i32_0 = arith.constant 0 : i32
    return %arg0, %c0_i32 : i32, i32
  }
}

</mosaic_0001>

<bundles_post_ra>
// kernel: tpu_custom_call.1
= control target key start
LH: loop header
LB: loop body
LE: loop exit
PB: predicated region body
PF: predicated region fallthrough
CT: control target
= control target key end

     0   :  { %9 = vsyncpa [#allocation4], 0  ;;  %s1015_s0 = inlined_call_operand.<no memory space> [shape: f32[1], index: 0, kind: input, shape index: {}]   ;;  %s1016_s1 = inlined_call_operand.hbm [shape: bf16[208,128], index: 1, kind: input, shape index: {}]   ;;  %s1017_s2 = inlined_call_operand.hbm [shape: bf16[128,128], index: 2, kind: input, shape index: {}]   ;;  %s1018_s3 = inlined_call_operand.vmem [shape: f32[208,1], index: 3, kind: output, shape index: {}]  }
   0x1   :  { %10 = vsyncpa [#allocation6], 0  ;;  %s728_s12 = smov [#allocation3]   ;;  %s680_s16 = scalar_lea.hbm %s1016_s1, 1664 }
   0x2   :  { %s18_s13 = sshll.u32 %s728_s12, 4  ;;  %p681_p0 = scmp.ne.s32.totalorder %s1016_s1, %s680_s16  ;;  %s19_s13 = int_to_ptr.vmem [resolvable:$true] %s18_s13 }
   0x3   :  { %p684_p1 = scmp.lt.u32.totalorder %s680_s16, %s1016_s1 }
   0x5   :  { %p686_p2 = pnand %p684_p1, %p681_p0 }
   0x7   :  { %689 = shalt.err (!%p686_p2)
}
   0x8   :  { %s690_s21 = scalar_lea.vmem %s19_s13, 1664  ;;  %p695_p4 = scmp.lt.s32.totalorder %s19_s13, %s19_s13 }
   0x9   :  { %p691_p3 = scmp.ne.s32.totalorder %s19_s13, %s690_s21  ;;  %p696_p5 = scmp.lt.s32.totalorder %s690_s21, %s690_s21 }
   0xb   :  { %p697_p6 = por %p696_p5, %p695_p4 }
   0xd   :  { %p698_p7 = pnand %p697_p6, %p691_p3 }
   0xf   :  { %701 = shalt.err (!%p698_p7)
}
  0x10   :  { %s729_s22 = smov 64   ;;  %s730_s23 = smov 4  }
  0x11   :  { %24 = dma.hbm_to_vmem [thread:$0]  %s1016_s1, 1664, %s19_s13, [#allocation4], %s729_s22, %s729_s22, %s730_s23  }
  0x12   :  { %s731_s26 = smov [#allocation5]   ;;  %s702_s30 = scalar_lea.hbm %s1017_s2, 1024 }
  0x13   :  { %s30_s27 = sshll.u32 %s731_s26, 4  ;;  %p703_p8 = scmp.ne.s32.totalorder %s1017_s2, %s702_s30  ;;  %s31_s27 = int_to_ptr.vmem [resolvable:$true] %s30_s27 }
  0x14   :  { %p706_p9 = scmp.lt.u32.totalorder %s702_s30, %s1017_s2 }
  0x16   :  { %p708_p10 = pnand %p706_p9, %p703_p8 }
  0x18   :  { %711 = shalt.err (!%p708_p10)
}
  0x19   :  { %s712_s8 = scalar_lea.vmem %s31_s27, 1024  ;;  %p717_p12 = scmp.lt.s32.totalorder %s31_s27, %s31_s27 }
  0x1a   :  { %p713_p11 = scmp.ne.s32.totalorder %s31_s27, %s712_s8  ;;  %p718_p13 = scmp.lt.s32.totalorder %s712_s8, %s712_s8 }
  0x1c   :  { %p719_p0 = por %p718_p13, %p717_p12 }
  0x1e   :  { %p720_p1 = pnand %p719_p0, %p713_p11 }
  0x20   :  { %723 = shalt.err (!%p720_p1)
}
  0x21   :  { %36 = dma.hbm_to_vmem [thread:$0]  %s1017_s2, 1024, %s31_s27, [#allocation6], %s729_s22, %s729_s22, %s730_s23  }
  0x22   :  { %724 = dma.done.wait [#allocation4], 1664  }
  0x23   :  { %725 = vsyncadd [#allocation4], 4294965632 }
  0x24   :  { %726 = dma.done.wait [#allocation6], 1024  }
  0x25   :  { %727 = vsyncadd [#allocation6], 4294966272  ;;  %v732_v0 = vmov 0.0   ;;  %vm733_vm0 = vmmov 0   ;;  %v646_v1 = vld [vmem:[#allocation5] sm:$0xff]   ;;  %v647_v2 = vld [vmem:[#allocation5 + $0x8] sm:$0xff]  }
  0x26   :  { %556 = vmatprep.subr.bf16.mxu0 %v732_v0  ;;  %624 = vmatprep.subr.bf16.mxu1 %v732_v0  ;;  %v648_v3 = vld [vmem:[#allocation5 + $0x10] sm:$0xff]   ;;  %v649_v4 = vld [vmem:[#allocation5 + $0x18] sm:$0xff]   ;;  %v650_v5 = vld [vmem:[#allocation5 + $0x20] sm:$0xff]   ;;  %vm481_vm1 = vcmask 7168  }
  0x27   :  { %572 = vmatprep.mubr.msk.bf16.mxu0 %vm733_vm0, %v732_v0  ;;  %600 = vmatprep.mubr.msk.bf16.mxu1 %vm733_vm0, %v732_v0  ;;  %v651_v6 = vld [vmem:[#allocation5 + $0x28] sm:$0xff]   ;;  %v652_v7 = vld [vmem:[#allocation5 + $0x30] sm:$0xff]   ;;  %v653_v8 = vld [vmem:[#allocation5 + $0x38] sm:$0xff]  }
  0x28   :  { %557 = vmatpush3.bf16.msra.mxu0 %v646_v1  ;;  %632 = vmatpush3.bf16.msra.mxu1 %v646_v1  ;;  %v796_v9 = vld [vmem:[#allocation3] sm:$0xff]   ;;  %v58_v10 = vld [vmem:[#allocation3 + $0x38] sm:$0xff]   ;;  %v803_v11 = vld [vmem:[#allocation3 + $0x8] sm:$0xff]  }
  0x29   :  { %558 = vmatprep.subr.bf16.mxu0 %v732_v0  ;;  %625 = vmatprep.subr.bf16.mxu1 %v732_v0  ;;  %v807_v12 = vld [vmem:[#allocation3 + $0x40] sm:$0xff]   ;;  %v813_v13 = vld [vmem:[#allocation3 + $0x10] sm:$0xff]   ;;  %v817_v14 = vld [vmem:[#allocation3 + $0x48] sm:$0xff]   ;;  %v349_v22 = vunpack.c.l.bf16 %v796_v9  ;;  %v363_v23 = vunpack.c.l.bf16 %v58_v10  ;;  %v364_v24 = vunpack.c.h.bf16 %v58_v10  ;;  %v350_v36 = vunpack.c.h.bf16 %v796_v9 }
  0x2a   :  { %v823_v15 = vld [vmem:[#allocation3 + $0x18] sm:$0xff]   ;;  %v827_v16 = vld [vmem:[#allocation3 + $0x50] sm:$0xff]   ;;  %v833_v17 = vld [vmem:[#allocation3 + $0x20] sm:$0xff]   ;;  %v351_v37 = vunpack.c.l.bf16 %v803_v11  ;;  %v365_v38 = vunpack.c.l.bf16 %v807_v12  ;;  %v352_v44 = vunpack.c.h.bf16 %v803_v11  ;;  %v366_v50 = vunpack.c.h.bf16 %v807_v12 }
  0x2b   :  { %v837_v18 = vld [vmem:[#allocation3 + $0x58] sm:$0xff]   ;;  %v843_v19 = vld [vmem:[#allocation3 + $0x28] sm:$0xff]   ;;  %v847_v20 = vld [vmem:[#allocation3 + $0x60] sm:$0xff]   ;;  %v353_v53 = vunpack.c.l.bf16 %v813_v13  ;;  %v367_v55 = vunpack.c.l.bf16 %v817_v14  ;;  %v354_v60 = vunpack.c.h.bf16 %v813_v13 }
  0x2c   :  { %559 = vmatpush3.bf16.msra.mxu0 %v647_v2  ;;  %633 = vmatpush3.bf16.msra.mxu1 %v647_v2  ;;  %v853_v21 = vld [vmem:[#allocation3 + $0x30] sm:$0xff]   ;;  %v368_v2 = vunpack.c.h.bf16 %v817_v14 }
  0x2d   :  { %560 = vmatprep.subr.bf16.mxu0 %v732_v0  ;;  %626 = vmatprep.subr.bf16.mxu1 %v732_v0 }
  0x30   :  { %561 = vmatpush3.bf16.msra.mxu0 %v648_v3  ;;  %634 = vmatpush3.bf16.msra.mxu1 %v648_v3 }
  0x31   :  { %562 = vmatprep.subr.bf16.mxu0 %v732_v0  ;;  %627 = vmatprep.subr.bf16.mxu1 %v732_v0 }
  0x34   :  { %563 = vmatpush3.bf16.msra.mxu0 %v649_v4  ;;  %635 = vmatpush3.bf16.msra.mxu1 %v649_v4 }
  0x35   :  { %564 = vmatprep.subr.bf16.mxu0 %v732_v0  ;;  %628 = vmatprep.subr.bf16.mxu1 %v732_v0 }
  0x38   :  { %565 = vmatpush3.bf16.msra.mxu0 %v650_v5  ;;  %636 = vmatpush3.bf16.msra.mxu1 %v650_v5  ;;  %v355_v5 = vunpack.c.l.bf16 %v823_v15 }
  0x39   :  { %566 = vmatprep.subr.bf16.mxu0 %v732_v0  ;;  %629 = vmatprep.subr.bf16.mxu1 %v732_v0 }
  0x3c   :  { %567 = vmatpush3.bf16.msra.mxu0 %v651_v6  ;;  %637 = vmatpush3.bf16.msra.mxu1 %v651_v6 }
  0x3d   :  { %568 = vmatprep.subr.bf16.mxu0 %v732_v0  ;;  %630 = vmatprep.subr.bf16.mxu1 %v732_v0 }
  0x40   :  { %569 = vmatpush3.bf16.msra.mxu0 %v652_v7  ;;  %638 = vmatpush3.bf16.msra.mxu1 %v652_v7  ;;  %v369_v7 = vunpack.c.l.bf16 %v827_v16 }
  0x41   :  { %570 = vmatprep.subr.bf16.mxu0 %v732_v0  ;;  %631 = vmatprep.subr.bf16.mxu1 %v732_v0 }
  0x44   :  { %571 = vmatpush3.bf16.msra.mxu0 %v653_v8  ;;  %639 = vmatpush3.bf16.msra.mxu1 %v653_v8 }
  0x47   :  { %573 = vmatmul.mubr.bf16.vlgmr.msra.gmra.mrb[0].mxu0 %v796_v9  ;;  %601 = vmatmul.mubr.bf16.vlgmr.msra.gmra.mrb[0].mxu1 %v58_v10 }
  0x48   :  { %576 = vmatprep.mubr.msk.bf16.mxu0 %vm733_vm0, %v732_v0  ;;  %604 = vmatprep.mubr.msk.bf16.mxu1 %vm733_vm0, %v732_v0 }
  0x4f   :  { %577 = vmatmul.mubr.bf16.gmra.mrb[4].mxu0 %v803_v11  ;;  %605 = vmatmul.mubr.bf16.gmra.mrb[4].mxu1 %v807_v12  ;;  %v356_v12 = vunpack.c.h.bf16 %v823_v15 }
  0x50   :  { %580 = vmatprep.mubr.msk.bf16.mxu0 %vm733_vm0, %v732_v0  ;;  %608 = vmatprep.mubr.msk.bf16.mxu1 %vm733_vm0, %v732_v0 }
  0x57   :  { %581 = vmatmul.mubr.bf16.gmra.mrb[8].mxu0 %v813_v13  ;;  %609 = vmatmul.mubr.bf16.gmra.mrb[8].mxu1 %v817_v14 }
  0x58   :  { %584 = vmatprep.mubr.msk.bf16.mxu0 %vm733_vm0, %v732_v0  ;;  %612 = vmatprep.mubr.msk.bf16.mxu1 %vm733_vm0, %v732_v0 }
  0x5f   :  { %585 = vmatmul.mubr.bf16.gmra.mrb[12].mxu0 %v823_v15  ;;  %613 = vmatmul.mubr.bf16.gmra.mrb[12].mxu1 %v827_v16 }
  0x60   :  { %588 = vmatprep.mubr.msk.bf16.mxu0 %vm733_vm0, %v732_v0  ;;  %616 = vmatprep.mubr.msk.bf16.mxu1 %vm733_vm0, %v732_v0 }
  0x67   :  { %589 = vmatmul.mubr.bf16.gmra.mrb[16].mxu0 %v833_v17  ;;  %617 = vmatmul.mubr.bf16.gmra.mrb[16].mxu1 %v837_v18 }
  0x68   :  { %592 = vmatprep.mubr.msk.bf16.mxu0 %vm733_vm0, %v732_v0  ;;  %620 = vmatprep.mubr.msk.bf16.mxu1 %vm733_vm0, %v732_v0 }
  0x6f   :  { %593 = vmatmul.mubr.bf16.gmra.mrb[20].mxu0 %v843_v19  ;;  %621 = vmatmul.mubr.bf16.gmra.mrb[20].mxu1 %v847_v20 }
  0x70   :  { %596 = vmatprep.mubr.msk.bf16.mxu0 %vm733_vm0, %v732_v0 }
  0x77   :  { %597 = vmatmul.mubr.bf16.gmra.mrb[24].mxu0 %v853_v21 }
 0x11a   :  { %v246_v25 = vpop.f32.mrb[0].mxu0  ;;  %v302_v26 = vpop.f32.mrb[0].mxu1 }
 0x11b   :  { %v574_v27 = vpop.f32.mrb[1].mxu0  ;;  %v602_v28 = vpop.f32.mrb[1].mxu1  ;;  %v375_v29 = vmul.f32 %v349_v22, %v246_v25  ;;  %v389_v32 = vmul.f32 %v363_v23, %v302_v26  ;;  %v370_v25 = vunpack.c.h.bf16 %v827_v16 }
 0x11c   :  { %v249_v30 = vpop.f32.mrb[2].mxu0  ;;  %v305_v31 = vpop.f32.mrb[2].mxu1  ;;  %v357_v28 = vunpack.c.l.bf16 %v833_v17 }
 0x11d   :  { %401 = vadd.xlane.f32.xlu0 %v375_v29  ;;  %v575_v33 = vpop.f32.mrb[3].mxu0  ;;  %v603_v34 = vpop.f32.mrb[3].mxu1  ;;  %v390_v35 = vmul.f32 %v364_v24, %v305_v31  ;;  %v376_v41 = vmul.f32 %v350_v36, %v249_v30  ;;  %v371_v30 = vunpack.c.l.bf16 %v837_v18 }
 0x11e   :  { %v358_v34 = vunpack.c.h.bf16 %v833_v17 }
 0x11f   :  { %431 = vadd.xlane.f32.xlu1 %v390_v35 }
 0x121   :  { %429 = vadd.xlane.f32.xlu0 %v389_v32 }
 0x122   :  { %v254_v39 = vpop.f32.mrb[4].mxu0  ;;  %v310_v40 = vpop.f32.mrb[4].mxu1 }
 0x123   :  { %v377_v42 = vmul.f32 %v351_v37, %v254_v39  ;;  %v578_v43 = vpop.f32.mrb[5].mxu0  ;;  %v606_v45 = vpop.f32.mrb[5].mxu1  ;;  %v391_v49 = vmul.f32 %v365_v38, %v310_v40  ;;  %v372_v39 = vunpack.c.h.bf16 %v837_v18 }
 0x124   :  { %v257_v46 = vpop.f32.mrb[6].mxu0  ;;  %v313_v47 = vpop.f32.mrb[6].mxu1 }
 0x125   :  { %403 = vadd.xlane.f32.xlu0 %v376_v41  ;;  %405 = vadd.xlane.f32.xlu1 %v377_v42  ;;  %v579_v48 = vpop.f32.mrb[7].mxu0  ;;  %v607_v51 = vpop.f32.mrb[7].mxu1  ;;  %v378_v52 = vmul.f32 %v352_v44, %v257_v46  ;;  %v392_v54 = vmul.f32 %v366_v50, %v313_v47  ;;  %v359_v42 = vunpack.c.l.bf16 %v843_v19  ;;  %v360_v47 = vunpack.c.h.bf16 %v843_v19 }
 0x129   :  { %433 = vadd.xlane.f32.xlu0 %v391_v49  ;;  %407 = vadd.xlane.f32.xlu1 %v378_v52 }
 0x12a   :  { %v262_v56 = vpop.f32.mrb[8].mxu0  ;;  %v318_v57 = vpop.f32.mrb[8].mxu1 }
 0x12b   :  { %v379_v58 = vmul.f32 %v353_v53, %v262_v56  ;;  %v582_v59 = vpop.f32.mrb[9].mxu0  ;;  %v610_v61 = vpop.f32.mrb[9].mxu1  ;;  %v393_v1 = vmul.f32 %v367_v55, %v318_v57  ;;  %v361_v53 = vunpack.c.l.bf16 %v853_v21  ;;  %v362_v55 = vunpack.c.h.bf16 %v853_v21 }
 0x12c   :  { %v265_v62 = vpop.f32.mrb[10].mxu0  ;;  %v321_v63 = vpop.f32.mrb[10].mxu1  ;;  %v374_v61 = vunpack.c.h.bf16 %v847_v20 }
 0x12d   :  { %435 = vadd.xlane.f32.xlu1 %v392_v54  ;;  %409 = vadd.xlane.f32.xlu0 %v379_v58  ;;  %v583_v0 = vpop.f32.mrb[11].mxu0  ;;  %v611_v3 = vpop.f32.mrb[11].mxu1  ;;  %v380_v4 = vmul.f32 %v354_v60, %v265_v62  ;;  %v394_v6 = vmul.f32 %v368_v2, %v321_v63  ;;  %v373_v54 = vunpack.c.l.bf16 %v847_v20 }
 0x12e   :  { %v883_v0 = vstv %s1015_s0 }
 0x131   :  { %437 = vadd.xlane.f32.xlu0 %v393_v1  ;;  %411 = vadd.xlane.f32.xlu1 %v380_v4 }
 0x132   :  { %v270_v8 = vpop.f32.mrb[12].mxu0  ;;  %v326_v9 = vpop.f32.mrb[12].mxu1 }
 0x133   :  { %v381_v10 = vmul.f32 %v355_v5, %v270_v8  ;;  %v586_v11 = vpop.f32.mrb[13].mxu0  ;;  %v614_v13 = vpop.f32.mrb[13].mxu1  ;;  %v395_v24 = vmul.f32 %v369_v7, %v326_v9 }
 0x134   :  { %v273_v22 = vpop.f32.mrb[14].mxu0  ;;  %v329_v23 = vpop.f32.mrb[14].mxu1 }
 0x135   :  { %439 = vadd.xlane.f32.xlu1 %v394_v6  ;;  %413 = vadd.xlane.f32.xlu0 %v381_v10  ;;  %v587_v14 = vpop.f32.mrb[15].mxu0  ;;  %v615_v26 = vpop.f32.mrb[15].mxu1  ;;  %v382_v27 = vmul.f32 %v356_v12, %v273_v22  ;;  %v396_v29 = vmul.f32 %v370_v25, %v329_v23 }
 0x139   :  { %441 = vadd.xlane.f32.xlu0 %v395_v24  ;;  %415 = vadd.xlane.f32.xlu1 %v382_v27 }
 0x13a   :  { %v278_v31 = vpop.f32.mrb[16].mxu0  ;;  %v334_v15 = vpop.f32.mrb[16].mxu1 }
 0x13b   :  { %v383_v32 = vmul.f32 %v357_v28, %v278_v31  ;;  %v590_v33 = vpop.f32.mrb[17].mxu0  ;;  %v618_v35 = vpop.f32.mrb[17].mxu1  ;;  %v397_v38 = vmul.f32 %v371_v30, %v334_v15 }
 0x13c   :  { %v281_v36 = vpop.f32.mrb[18].mxu0  ;;  %v337_v37 = vpop.f32.mrb[18].mxu1 }
 0x13d   :  { %443 = vadd.xlane.f32.xlu1 %v396_v29  ;;  %417 = vadd.xlane.f32.xlu0 %v383_v32  ;;  %v591_v16 = vpop.f32.mrb[19].mxu0  ;;  %v619_v40 = vpop.f32.mrb[19].mxu1  ;;  %v384_v41 = vmul.f32 %v358_v34, %v281_v36  ;;  %v398_v43 = vmul.f32 %v372_v39, %v337_v37 }
 0x141   :  { %445 = vadd.xlane.f32.xlu0 %v397_v38  ;;  %419 = vadd.xlane.f32.xlu1 %v384_v41 }
 0x142   :  { %v286_v44 = vpop.f32.mrb[20].mxu0  ;;  %v342_v45 = vpop.f32.mrb[20].mxu1 }
 0x143   :  { %v385_v46 = vmul.f32 %v359_v42, %v286_v44  ;;  %v594_v17 = vpop.f32.mrb[21].mxu0  ;;  %v622_v48 = vpop.f32.mrb[21].mxu1  ;;  %v399_v19 = vmul.f32 %v373_v54, %v342_v45 }
 0x144   :  { %v289_v49 = vpop.f32.mrb[22].mxu0  ;;  %v345_v50 = vpop.f32.mrb[22].mxu1 }
 0x145   :  { %447 = vadd.xlane.f32.xlu1 %v398_v43  ;;  %421 = vadd.xlane.f32.xlu0 %v385_v46  ;;  %v595_v51 = vpop.f32.mrb[23].mxu0  ;;  %v623_v18 = vpop.f32.mrb[23].mxu1  ;;  %v386_v52 = vmul.f32 %v360_v47, %v289_v49  ;;  %v400_v63 = vmul.f32 %v374_v61, %v345_v50 }
 0x149   :  { %423 = vadd.xlane.f32.xlu1 %v386_v52 }
 0x14a   :  { %v294_v56 = vpop.f32.mrb[24].mxu0 }
 0x14b   :  { %v387_v57 = vmul.f32 %v361_v53, %v294_v56  ;;  %v598_v58 = vpop.f32.mrb[25].mxu0 }
 0x14c   :  { %v297_v59 = vpop.f32.mrb[26].mxu0 }
 0x14d   :  { %v388_v60 = vmul.f32 %v362_v55, %v297_v59  ;;  %425 = vadd.xlane.f32.xlu0 %v387_v57  ;;  %v599_v62 = vpop.f32.mrb[27].mxu0 }
 0x14f   :  { %427 = vadd.xlane.f32.xlu1 %v388_v60 }
 0x151   :  { %449 = vadd.xlane.f32.xlu0 %v399_v19 }
 0x153   :  { %451 = vadd.xlane.f32.xlu1 %v400_v63 }
 0x1aa   :  { %v402_v21 = vpop.xlane.xlu0 %401 }
 0x1ab   :  { %v455_v1 = vadd.f32 %v883_v0, %v402_v21 }
 0x1ac   :  { %v432_v2 = vpop.xlane.xlu1 %431 }
 0x1ad   :  { %482 = vst.msk [vmem:[%s1018_s3] sm:$0xff] %vm481_vm1, %v455_v1  ;;  %v470_v20 = vadd.f32 %v883_v0, %v432_v2 }
 0x1ae   :  { %v430_v3 = vpop.xlane.xlu0 %429 }
 0x1af   :  { %497 = vst.msk [vmem:[%s1018_s3 + $0x78] sm:$0xff] %vm481_vm1, %v470_v20  ;;  %v469_v4 = vadd.f32 %v883_v0, %v430_v3 }
 0x1b1   :  { %496 = vst.msk [vmem:[%s1018_s3 + $0x70] sm:$0xff] %vm481_vm1, %v469_v4 }
 0x1b2   :  { %v404_v5 = vpop.xlane.xlu0 %403  ;;  %v406_v6 = vpop.xlane.xlu1 %405 }
 0x1b3   :  { %v456_v7 = vadd.f32 %v883_v0, %v404_v5  ;;  %v457_v8 = vadd.f32 %v883_v0, %v406_v6 }
 0x1b5   :  { %483 = vst.msk [vmem:[%s1018_s3 + $0x8] sm:$0xff] %vm481_vm1, %v456_v7  ;;  %484 = vst.msk [vmem:[%s1018_s3 + $0x10] sm:$0xff] %vm481_vm1, %v457_v8 }
 0x1b6   :  { %v434_v9 = vpop.xlane.xlu0 %433  ;;  %v408_v10 = vpop.xlane.xlu1 %407 }
 0x1b7   :  { %v471_v11 = vadd.f32 %v883_v0, %v434_v9  ;;  %v458_v12 = vadd.f32 %v883_v0, %v408_v10 }
 0x1b9   :  { %498 = vst.msk [vmem:[%s1018_s3 + $0x80] sm:$0xff] %vm481_vm1, %v471_v11  ;;  %485 = vst.msk [vmem:[%s1018_s3 + $0x18] sm:$0xff] %vm481_vm1, %v458_v12 }
 0x1ba   :  { %v436_v13 = vpop.xlane.xlu1 %435  ;;  %v410_v22 = vpop.xlane.xlu0 %409 }
 0x1bb   :  { %v472_v23 = vadd.f32 %v883_v0, %v436_v13  ;;  %v459_v14 = vadd.f32 %v883_v0, %v410_v22 }
 0x1bd   :  { %499 = vst.msk [vmem:[%s1018_s3 + $0x88] sm:$0xff] %vm481_vm1, %v472_v23  ;;  %486 = vst.msk [vmem:[%s1018_s3 + $0x20] sm:$0xff] %vm481_vm1, %v459_v14 }
 0x1be   :  { %v438_v24 = vpop.xlane.xlu0 %437  ;;  %v412_v25 = vpop.xlane.xlu1 %411 }
 0x1bf   :  { %v473_v26 = vadd.f32 %v883_v0, %v438_v24  ;;  %v460_v27 = vadd.f32 %v883_v0, %v412_v25 }
 0x1c1   :  { %500 = vst.msk [vmem:[%s1018_s3 + $0x90] sm:$0xff] %vm481_vm1, %v473_v26  ;;  %487 = vst.msk [vmem:[%s1018_s3 + $0x28] sm:$0xff] %vm481_vm1, %v460_v27 }
 0x1c2   :  { %v440_v28 = vpop.xlane.xlu1 %439  ;;  %v414_v29 = vpop.xlane.xlu0 %413 }
 0x1c3   :  { %v474_v30 = vadd.f32 %v883_v0, %v440_v28  ;;  %v461_v31 = vadd.f32 %v883_v0, %v414_v29 }
 0x1c5   :  { %501 = vst.msk [vmem:[%s1018_s3 + $0x98] sm:$0xff] %vm481_vm1, %v474_v30  ;;  %488 = vst.msk [vmem:[%s1018_s3 + $0x30] sm:$0xff] %vm481_vm1, %v461_v31 }
 0x1c6   :  { %v442_v15 = vpop.xlane.xlu0 %441  ;;  %v416_v32 = vpop.xlane.xlu1 %415 }
 0x1c7   :  { %v475_v33 = vadd.f32 %v883_v0, %v442_v15  ;;  %v462_v34 = vadd.f32 %v883_v0, %v416_v32 }
 0x1c9   :  { %502 = vst.msk [vmem:[%s1018_s3 + $0xa0] sm:$0xff] %vm481_vm1, %v475_v33  ;;  %489 = vst.msk [vmem:[%s1018_s3 + $0x38] sm:$0xff] %vm481_vm1, %v462_v34 }
 0x1ca   :  { %v444_v35 = vpop.xlane.xlu1 %443  ;;  %v418_v36 = vpop.xlane.xlu0 %417 }
 0x1cb   :  { %v476_v37 = vadd.f32 %v883_v0, %v444_v35  ;;  %v463_v16 = vadd.f32 %v883_v0, %v418_v36 }
 0x1cd   :  { %503 = vst.msk [vmem:[%s1018_s3 + $0xa8] sm:$0xff] %vm481_vm1, %v476_v37  ;;  %490 = vst.msk [vmem:[%s1018_s3 + $0x40] sm:$0xff] %vm481_vm1, %v463_v16 }
 0x1ce   :  { %v446_v38 = vpop.xlane.xlu0 %445  ;;  %v420_v39 = vpop.xlane.xlu1 %419 }
 0x1cf   :  { %v477_v40 = vadd.f32 %v883_v0, %v446_v38  ;;  %v464_v41 = vadd.f32 %v883_v0, %v420_v39 }
 0x1d1   :  { %504 = vst.msk [vmem:[%s1018_s3 + $0xb0] sm:$0xff] %vm481_vm1, %v477_v40  ;;  %491 = vst.msk [vmem:[%s1018_s3 + $0x48] sm:$0xff] %vm481_vm1, %v464_v41 }
 0x1d2   :  { %v448_v42 = vpop.xlane.xlu1 %447  ;;  %v422_v43 = vpop.xlane.xlu0 %421 }
 0x1d3   :  { %v478_v44 = vadd.f32 %v883_v0, %v448_v42  ;;  %v465_v45 = vadd.f32 %v883_v0, %v422_v43 }
 0x1d5   :  { %505 = vst.msk [vmem:[%s1018_s3 + $0xb8] sm:$0xff] %vm481_vm1, %v478_v44  ;;  %492 = vst.msk [vmem:[%s1018_s3 + $0x50] sm:$0xff] %vm481_vm1, %v465_v45 }
 0x1d6   :  { %v424_v46 = vpop.xlane.xlu1 %423 }
 0x1d7   :  { %v466_v17 = vadd.f32 %v883_v0, %v424_v46 }
 0x1d9   :  { %493 = vst.msk [vmem:[%s1018_s3 + $0x58] sm:$0xff] %vm481_vm1, %v466_v17 }
 0x1da   :  { %v426_v47 = vpop.xlane.xlu0 %425 }
 0x1db   :  { %v467_v48 = vadd.f32 %v883_v0, %v426_v47 }
 0x1dc   :  { %v428_v49 = vpop.xlane.xlu1 %427 }
 0x1dd   :  { %494 = vst.msk [vmem:[%s1018_s3 + $0x60] sm:$0xff] %vm481_vm1, %v467_v48  ;;  %v468_v50 = vadd.f32 %v883_v0, %v428_v49 }
 0x1de   :  { %v450_v51 = vpop.xlane.xlu0 %449 }
 0x1df   :  { %495 = vst.msk [vmem:[%s1018_s3 + $0x68] sm:$0xff] %vm481_vm1, %v468_v50  ;;  %v479_v18 = vadd.f32 %v883_v0, %v450_v51 }
 0x1e0   :  { %v452_v52 = vpop.xlane.xlu1 %451 }
 0x1e1   :  { %506 = vst.msk [vmem:[%s1018_s3 + $0xc0] sm:$0xff] %vm481_vm1, %v479_v18  ;;  %v480_v53 = vadd.f32 %v883_v0, %v452_v52 }
 0x1e3   :  { %507 = vst.msk [vmem:[%s1018_s3 + $0xc8] sm:$0xff] %vm481_vm1, %v480_v53 }
 0x1e4   :  { %512 = vsyncpa [#allocation4], 1 }
 0x1e5   :  { %513 = vsyncpa [#allocation6], 1 }

</bundles_post_ra>
